<compile_context>
chip_gen: v7x
topology: tpu7x:2x2x1
jax: 0.10.0
libtpu: 0.0.40
codegen_flags: <defaults>
</compile_context>

<pallas_src>
import jax
import jax.numpy as jnp
from jax.experimental import pallas as pl
from jax.experimental.pallas import tpu as pltpu


def _round_up(x: int, m: int) -> int:
    return (x + m - 1) // m * m


def _cdiv(a: int, b: int) -> int:
    return (a + b - 1) // b


# ----------------------------------------------------------------------------- kernels
def _reglu_kernel_resident(x_ref, w1_ref, w3_ref, w2_ref, o_ref):
    # x_ref: [TM, dim_p] bf16; w1/w3: [dim_p, hid_p] bf16; w2: [hid_p, dim_p] bf16
    x = x_ref[...]
    h1 = jnp.dot(x, w1_ref[...], preferred_element_type=jnp.float32)
    h3 = jnp.dot(x, w3_ref[...], preferred_element_type=jnp.float32)
    h = (jnp.maximum(h1, 0.0) * h3).astype(w2_ref.dtype)
    o_ref[...] = jnp.dot(h, w2_ref[...],
                         preferred_element_type=jnp.float32).astype(o_ref.dtype)


def _reglu_kernel_tiled(x_ref, w1_ref, w3_ref, w2_ref, o_ref, acc_ref):
    # grid = (M tiles, hidden tiles); hidden axis is the inner (reduction) axis.
    # x_ref: [TM, dim_p]; w1/w3: [dim_p, TH]; w2: [TH, dim_p]; acc_ref: [TM, dim_p] f32
    k = pl.program_id(1)

    @pl.when(k == 0)
    def _():
        acc_ref[...] = jnp.zeros_like(acc_ref)

    x = x_ref[...]
    h1 = jnp.dot(x, w1_ref[...], preferred_element_type=jnp.float32)
    h3 = jnp.dot(x, w3_ref[...], preferred_element_type=jnp.float32)
    h = (jnp.maximum(h1, 0.0) * h3).astype(w2_ref.dtype)
    acc_ref[...] += jnp.dot(h, w2_ref[...], preferred_element_type=jnp.float32)

    @pl.when(k == pl.num_programs(1) - 1)
    def _():
        o_ref[...] = acc_ref[...].astype(o_ref.dtype)


# ----------------------------------------------------------------------------- weight prep
def prepare_reglu_weights(w1, w2, w3, compute_dtype=jnp.bfloat16, lane=128):
    """One-time weight prep: transpose to (in, out), cast to bf16, pad to lane multiples.

    w1, w3: [hidden, dim] (torch nn.Linear layout), w2: [dim, hidden].
    Returns (w1t, w2t, w3t): w1t/w3t [dim_p, hid_p], w2t [hid_p, dim_p].
    Zero padding is exact: padded hidden columns give relu(0)*0 = 0 and padded
    dim rows/cols of W2 are zero, so the valid output block is unchanged.
    """
    hidden, dim = w1.shape
    dim_p = _round_up(dim, lane)
    hid_p = _round_up(hidden, lane)
    w1t = jnp.pad(w1.T.astype(compute_dtype), ((0, dim_p - dim), (0, hid_p - hidden)))
    w3t = jnp.pad(w3.T.astype(compute_dtype), ((0, dim_p - dim), (0, hid_p - hidden)))
    w2t = jnp.pad(w2.T.astype(compute_dtype), ((0, hid_p - hidden), (0, dim_p - dim)))
    return w1t, w2t, w3t


# ----------------------------------------------------------------------------- sizing helpers
def _vmem_budget_bytes() -> int:
    """Generation-aware VMEM budget with headroom for compiler scratch/semaphores."""
    try:
        cap = int(pltpu.get_tpu_info().vmem_capacity_bytes)   # 64 MiB v7x, 128 MiB v5e/v6e
    except Exception:
        cap = 64 << 20                                         # conservative fallback
    return int(cap * 0.875)                                    # ~56 MiB v7x, ~112 MiB v6e/v5e


def _choose_tm(m16: int, target: int) -> int:
    """Token tile: multiple of 16 (bf16 sublanes), snapped to 256/128 (MXU tiles),
    and >=2 grid steps when there is enough work (2 TensorCores on v7x)."""
    if m16 <= 16:
        return m16
    tm = min(target, m16)
    for align in (256, 128, 16):
        if tm >= align:
            tm = (tm // align) * align
            break
    if tm >= m16 and m16 >= 32:
        tm = _round_up(_cdiv(m16, 2), 16)
    return tm


# ----------------------------------------------------------------------------- entry point
def reglu_pallas(x, w1t, w2t, w3t, *, tm_resident=256, tm_tiled=512):
    """x: [B, S, dim].  w1t/w3t: [dim_p, hid_p] bf16.  w2t: [hid_p, dim_p] bf16."""
    B, S, dim = x.shape
    dim_p, hid_p = w1t.shape
    compute_dtype = w1t.dtype
    out_dtype = x.dtype
    out_isz = jnp.dtype(out_dtype).itemsize
    c_isz = jnp.dtype(compute_dtype).itemsize

    M = B * S
    M16 = _round_up(M, 16)
    budget = _vmem_budget_bytes()

    w_bytes = 3 * dim_p * hid_p * c_isz          # one copy of W1 + W3 + W2

    def io_bytes(tm):
        # double-buffered x tile + double-buffered out tile
        return 2 * tm * dim_p * c_isz + 2 * tm * dim_p * out_isz

    def resident_need(tm, wbuf):
        # wbuf copies of each weight + compiler-materialized f32 h1/h3, bf16 gated
        # activation and the f32 matmul result before the cast/store.
        inter = 2 * tm * hid_p * 4 + tm * hid_p * c_isz + tm * dim_p * 4
        return wbuf * w_bytes + io_bytes(tm) + inter + (2 << 20)

    def tiled_need(tm, th):
        wblk = 2 * 3 * dim_p * th * c_isz        # double-buffered weight blocks
        inter = 2 * tm * th * 4 + tm * th * c_isz + tm * dim_p * 4
        acc = tm * dim_p * 4
        return wblk + io_bytes(tm) + inter + acc + (2 << 20)

    # ---- path selection -----------------------------------------------------
    tm_res = _choose_tm(M16, tm_resident)
    use_resident = resident_need(tm_res, 2) <= budget
    single_buffer_weights = False
    if not use_resident and resident_need(tm_res, 1) <= budget:
        # Weights fit once but not twice: single-buffer them (constant block
        # index => double buffering buys nothing, only VMEM).
        use_resident = True
        single_buffer_weights = True

    if use_resident:
        TM = tm_res
        TH = hid_p
    else:
        TM = _choose_tm(M16, tm_tiled)
        th_candidates = [c for c in (2048, 1024, 512, 256, 128) if hid_p % c == 0]
        TH = next((c for c in th_candidates if tiled_need(TM, c) <= budget),
                  th_candidates[-1])

    M_p = _round_up(M16, TM)
    grid_m = M_p // TM

    # ---- activations: cast/pad only when actually needed ---------------------
    x2d = x.reshape(M, dim)
    if x2d.dtype != compute_dtype:
        x2d = x2d.astype(compute_dtype)
    needs_pad = (M_p != M) or (dim_p != dim)
    if needs_pad:
        x2d = jnp.pad(x2d, ((0, M_p - M), (0, dim_p - dim)))

    flops = 6 * M_p * dim_p * hid_p              # three matmuls
    vmem_limit = int(budget)

    if use_resident:
        w_kwargs = dict(pipeline_mode=pl.Buffered(1)) if single_buffer_weights else {}
        out = pl.pallas_call(
            _reglu_kernel_resident,
            out_shape=jax.ShapeDtypeStruct((M_p, dim_p), out_dtype),
            grid=(grid_m,),
            in_specs=[
                pl.BlockSpec((TM, dim_p), lambda i: (i, 0)),               # x, streamed
                pl.BlockSpec((dim_p, hid_p), lambda i: (0, 0), **w_kwargs),  # W1, resident
                pl.BlockSpec((dim_p, hid_p), lambda i: (0, 0), **w_kwargs),  # W3, resident
                pl.BlockSpec((hid_p, dim_p), lambda i: (0, 0), **w_kwargs),  # W2, resident
            ],
            out_specs=pl.BlockSpec((TM, dim_p), lambda i: (i, 0)),
            compiler_params=pltpu.CompilerParams(
                dimension_semantics=("parallel",),
                vmem_limit_bytes=vmem_limit,
            ),
            cost_estimate=pl.CostEstimate(
                flops=flops, transcendentals=0,
                bytes_accessed=(M_p * dim_p * c_isz + w_bytes
                                + M_p * dim_p * out_isz)),
        )(x2d, w1t, w3t, w2t)
    else:
        out = pl.pallas_call(
            _reglu_kernel_tiled,
            out_shape=jax.ShapeDtypeStruct((M_p, dim_p), out_dtype),
            grid=(grid_m, hid_p // TH),
            in_specs=[
                pl.BlockSpec((TM, dim_p), lambda i, k: (i, 0)),   # x, fixed over k
                pl.BlockSpec((dim_p, TH), lambda i, k: (0, k)),   # W1 chunk, streamed
                pl.BlockSpec((dim_p, TH), lambda i, k: (0, k)),   # W3 chunk, streamed
                pl.BlockSpec((TH, dim_p), lambda i, k: (k, 0)),   # W2 chunk, streamed
            ],
            out_specs=pl.BlockSpec((TM, dim_p), lambda i, k: (i, 0)),
            scratch_shapes=[pltpu.VMEM((TM, dim_p), jnp.float32)],  # f32 accumulator
            compiler_params=pltpu.CompilerParams(
                dimension_semantics=("parallel", "arbitrary"),
                vmem_limit_bytes=vmem_limit,
            ),
            cost_estimate=pl.CostEstimate(
                flops=flops, transcendentals=0,
                bytes_accessed=(M_p * dim_p * c_isz + w_bytes * grid_m
                                + M_p * dim_p * out_isz)),
        )(x2d, w1t, w3t, w2t)

    if needs_pad:
        out = out[:M, :dim]
    return out.reshape(B, S, dim)


# ----------------------------------------------------------------------------- reference
def reglu_reference(x, w1, w2, w3, compute_dtype=jnp.bfloat16):
    """bf16-operand / f32-accumulation reference matching the kernel's compute path."""
    xb = x.astype(compute_dtype)
    h1 = jnp.dot(xb, w1.T.astype(compute_dtype), preferred_element_type=jnp.float32)
    h3 = jnp.dot(xb, w3.T.astype(compute_dtype), preferred_element_type=jnp.float32)
    h = (jnp.maximum(h1, 0.0) * h3).astype(compute_dtype)
    return jnp.dot(h, w2.T.astype(compute_dtype),
                   preferred_element_type=jnp.float32).astype(x.dtype)


if __name__ == "__main__":
    # Mirror the module's __init__: dim=32, hidden_dim=None, multiple_of=4, bias=False
    dim = 32
    multiple_of = 4
    hidden_dim = 4 * dim
    hidden_dim = int(2 * hidden_dim / 3)
    hidden_dim = multiple_of * ((hidden_dim + multiple_of - 1) // multiple_of)  # -> 88

    key = jax.random.PRNGKey(0)
    kx, k1, k2, k3 = jax.random.split(key, 4)

    B, S = 2, 8
    x = jax.random.normal(kx, (B, S, dim), dtype=jnp.float32)

    # nn.Linear weights: (out_features, in_features), bias=False; deterministic init.
    w1 = jax.random.normal(k1, (hidden_dim, dim), dtype=jnp.float32) * 0.05
    w2 = jax.random.normal(k2, (dim, hidden_dim), dtype=jnp.float32) * 0.05
    w3 = jax.random.normal(k3, (hidden_dim, dim), dtype=jnp.float32) * 0.05

    # One-time weight prep (transpose + bf16 cast + pad), outside the hot path.
    w1t, w2t, w3t = prepare_reglu_weights(w1, w2, w3)

    reglu_fn = jax.jit(reglu_pallas)
    y = reglu_fn(x, w1t, w2t, w3t)
    jax.block_until_ready(y)

    y_ref = reglu_reference(x, w1, w2, w3)
    assert y.shape == (B, S, dim)
    assert jnp.allclose(y, y_ref, atol=2e-3, rtol=2e-2), "mismatch vs reference"

    print("KERNEL_OK")
</pallas_src>

<mosaic_0001>
module attributes {stable_mosaic.version = 11 : i64} {
  func.func @_reglu_kernel_resident(%arg0: i32, %arg1: memref<16x128xbf16, #tpu.memory_space<vmem>>, %arg2: memref<128x128xbf16, #tpu.memory_space<vmem>>, %arg3: memref<128x128xbf16, #tpu.memory_space<vmem>>, %arg4: memref<128x128xbf16, #tpu.memory_space<vmem>>, %arg5: memref<16x128xf32, #tpu.memory_space<vmem>>) attributes {dimension_semantics = [#tpu.dimension_semantics<parallel>], iteration_bounds = array<i64: 1>, scalar_prefetch = 0 : i64, scratch_operands = 0 : i64, tpu.core_type = #tpu.core_type<tc>, window_params = [{transform_indices = @transform_0, window_bounds = array<i64: 16, 128>}, {pipeline_mode = #tpu.pipeline_mode<synchronous>, transform_indices = @transform_1, window_bounds = array<i64: 128, 128>}, {pipeline_mode = #tpu.pipeline_mode<synchronous>, transform_indices = @transform_2, window_bounds = array<i64: 128, 128>}, {pipeline_mode = #tpu.pipeline_mode<synchronous>, transform_indices = @transform_3, window_bounds = array<i64: 128, 128>}, {transform_indices = @transform_4, window_bounds = array<i64: 16, 128>}]} {
    %c0 = arith.constant 0 : index
    %c0_0 = arith.constant 0 : index
    %0 = vector.load %arg1[%c0, %c0_0] : memref<16x128xbf16, #tpu.memory_space<vmem>>, vector<16x128xbf16>
    %c0_1 = arith.constant 0 : index
    %c0_2 = arith.constant 0 : index
    %1 = vector.load %arg2[%c0_1, %c0_2] : memref<128x128xbf16, #tpu.memory_space<vmem>>, vector<128x128xbf16>
    %cst = arith.constant dense<0.000000e+00> : vector<16x128xf32>
    %2 = tpu.matmul %0, %1, %cst {dimension_numbers = #tpu.dot_dimension_numbers<[1], [0], [0], [1], [0, 0, 1, 1], [], []>} : vector<16x128xbf16>, vector<128x128xbf16>, vector<16x128xf32> -> vector<16x128xf32>
    %c0_3 = arith.constant 0 : index
    %c0_4 = arith.constant 0 : index
    %3 = vector.load %arg3[%c0_3, %c0_4] : memref<128x128xbf16, #tpu.memory_space<vmem>>, vector<128x128xbf16>
    %cst_5 = arith.constant dense<0.000000e+00> : vector<16x128xf32>
    %4 = tpu.matmul %0, %3, %cst_5 {dimension_numbers = #tpu.dot_dimension_numbers<[1], [0], [0], [1], [0, 0, 1, 1], [], []>} : vector<16x128xbf16>, vector<128x128xbf16>, vector<16x128xf32> -> vector<16x128xf32>
    %cst_6 = arith.constant 0.000000e+00 : f32
    %5 = vector.broadcast %cst_6 : f32 to vector<16x128xf32>
    %6 = arith.maximumf %2, %5 : vector<16x128xf32>
    %7 = arith.mulf %6, %4 : vector<16x128xf32>
    %8 = arith.truncf %7 : vector<16x128xf32> to vector<16x128xbf16>
    %c0_7 = arith.constant 0 : index
    %c0_8 = arith.constant 0 : index
    %9 = vector.load %arg4[%c0_7, %c0_8] : memref<128x128xbf16, #tpu.memory_space<vmem>>, vector<128x128xbf16>
    %cst_9 = arith.constant dense<0.000000e+00> : vector<16x128xf32>
    %10 = tpu.matmul %8, %9, %cst_9 {dimension_numbers = #tpu.dot_dimension_numbers<[1], [0], [0], [1], [0, 0, 1, 1], [], []>} : vector<16x128xbf16>, vector<128x128xbf16>, vector<16x128xf32> -> vector<16x128xf32>
    %c0_10 = arith.constant 0 : index
    %c0_11 = arith.constant 0 : index
    %11 = vector.load %arg5[%c0_10, %c0_11] : memref<16x128xf32, #tpu.memory_space<vmem>>, vector<16x128xf32>
    tpu.vector_store %arg5[%c0_10, %c0_11], %10 {strides = array<i32>} : memref<16x128xf32, #tpu.memory_space<vmem>>, vector<16x128xf32>,
    return
  }
  func.func @transform_0(%arg0: i32) -> (i32, i32) {
    %c0_i32 = arith.constant 0 : i32
    %c0_i32_0 = arith.constant 0 : i32
    return %arg0, %c0_i32 : i32, i32
  }
  func.func @transform_1(%arg0: i32) -> (i32, i32) {
    %c0_i32 = arith.constant 0 : i32
    %c0_i32_0 = arith.constant 0 : i32
    %c0_i32_1 = arith.constant 0 : i32
    return %c0_i32, %c0_i32_0 : i32, i32
  }
  func.func @transform_2(%arg0: i32) -> (i32, i32) {
    %c0_i32 = arith.constant 0 : i32
    %c0_i32_0 = arith.constant 0 : i32
    %c0_i32_1 = arith.constant 0 : i32
    return %c0_i32, %c0_i32_0 : i32, i32
  }
  func.func @transform_3(%arg0: i32) -> (i32, i32) {
    %c0_i32 = arith.constant 0 : i32
    %c0_i32_0 = arith.constant 0 : i32
    %c0_i32_1 = arith.constant 0 : i32
    return %c0_i32, %c0_i32_0 : i32, i32
  }
  func.func @transform_4(%arg0: i32) -> (i32, i32) {
    %c0_i32 = arith.constant 0 : i32
    %c0_i32_0 = arith.constant 0 : i32
    return %arg0, %c0_i32 : i32, i32
  }
}

</mosaic_0001>

<bundles_post_ra>
// kernel: reglu_pallas.1
= control target key start
LH: loop header
LB: loop body
LE: loop exit
PB: predicated region body
PF: predicated region fallthrough
CT: control target
= control target key end

     0   :  { %9 = vsyncpa [#allocation3], 0  ;;  %s732_s0 = inlined_call_operand.vmem [shape: bf16[16,128], index: 0, kind: input, shape index: {}]   ;;  %s733_s1 = inlined_call_operand.hbm [shape: bf16[128,128], index: 1, kind: input, shape index: {}]   ;;  %s734_s2 = inlined_call_operand.hbm [shape: bf16[128,128], index: 2, kind: input, shape index: {}]   ;;  %s735_s3 = inlined_call_operand.hbm [shape: bf16[128,128], index: 3, kind: input, shape index: {}]   ;;  %s736_s4 = inlined_call_operand.vmem [shape: f32[16,128], index: 4, kind: output, shape index: {}]  }
   0x1   :  { %10 = vsyncpa [#allocation5], 0  ;;  %s609_s15 = smov [#allocation4]   ;;  %s610_s17 = smov [#allocation2]  }
   0x2   :  { %s30_s16 = sshll.u32 %s609_s15, 4  ;;  %s18_s18 = sshll.u32 %s610_s17, 4  ;;  %s31_s16 = int_to_ptr.vmem [resolvable:$true] %s30_s16  ;;  %s641_s18 = int_to_ptr.vmem [resolvable:$true] %s18_s18 }
   0x3   :  { %s539_s21 = scalar_lea.hbm %s734_s2, 1024 }
   0x4   :  { %p540_p0 = scmp.ne.s32.totalorder %s734_s2, %s539_s21  ;;  %p543_p1 = scmp.lt.u32.totalorder %s539_s21, %s734_s2 }
   0x6   :  { %p545_p2 = pnand %p543_p1, %p540_p0 }
   0x8   :  { %548 = shalt.err (!%p545_p2)
}
   0x9   :  { %s549_s26 = scalar_lea.vmem %s31_s16, 1024  ;;  %p554_p4 = scmp.lt.s32.totalorder %s31_s16, %s31_s16 }
   0xa   :  { %p550_p3 = scmp.ne.s32.totalorder %s31_s16, %s549_s26  ;;  %p555_p5 = scmp.lt.s32.totalorder %s549_s26, %s549_s26 }
   0xc   :  { %p556_p6 = por %p555_p5, %p554_p4 }
   0xe   :  { %p557_p7 = pnand %p556_p6, %p550_p3 }
  0x10   :  { %560 = shalt.err (!%p557_p7)
}
  0x11   :  { %s611_s27 = smov 64   ;;  %s612_s28 = smov 4  }
  0x12   :  { %36 = dma.hbm_to_vmem [thread:$0]  %s734_s2, 1024, %s31_s16, [#allocation5], %s611_s27, %s611_s27, %s612_s28  }
  0x13   :  { %s561_s7 = scalar_lea.hbm %s733_s1, 1024 }
  0x14   :  { %p562_p8 = scmp.ne.s32.totalorder %s733_s1, %s561_s7  ;;  %p565_p9 = scmp.lt.u32.totalorder %s561_s7, %s733_s1 }
  0x16   :  { %p567_p10 = pnand %p565_p9, %p562_p8 }
  0x18   :  { %570 = shalt.err (!%p567_p10)
}
  0x19   :  { %s571_s12 = scalar_lea.vmem %s641_s18, 1024  ;;  %p576_p12 = scmp.lt.s32.totalorder %s641_s18, %s641_s18 }
  0x1a   :  { %p572_p11 = scmp.ne.s32.totalorder %s641_s18, %s571_s12  ;;  %p577_p13 = scmp.lt.s32.totalorder %s571_s12, %s571_s12 }
  0x1c   :  { %p578_p0 = por %p577_p13, %p576_p12 }
  0x1e   :  { %p579_p1 = pnand %p578_p0, %p572_p11 }
  0x20   :  { %582 = shalt.err (!%p579_p1)
}
  0x21   :  { %24 = dma.hbm_to_vmem [thread:$0]  %s733_s1, 1024, %s641_s18, [#allocation3], %s611_s27, %s611_s27, %s612_s28  }
  0x22   :  { %s613_s14 = smov [#allocation6]   ;;  %s583_s19 = scalar_lea.hbm %s735_s3, 1024 }
  0x23   :  { %s42_s15 = sshll.u32 %s613_s14, 4  ;;  %p584_p2 = scmp.ne.s32.totalorder %s735_s3, %s583_s19  ;;  %s43_s15 = int_to_ptr.vmem [resolvable:$true] %s42_s15 }
  0x24   :  { %p587_p3 = scmp.lt.u32.totalorder %s583_s19, %s735_s3 }
  0x26   :  { %p589_p4 = pnand %p587_p3, %p584_p2 }
  0x28   :  { %592 = shalt.err (!%p589_p4)
}
  0x29   :  { %s593_s24 = scalar_lea.vmem %s43_s15, 1024  ;;  %p598_p6 = scmp.lt.s32.totalorder %s43_s15, %s43_s15 }
  0x2a   :  { %p594_p5 = scmp.ne.s32.totalorder %s43_s15, %s593_s24  ;;  %p599_p7 = scmp.lt.s32.totalorder %s593_s24, %s593_s24 }
  0x2c   :  { %p600_p8 = por %p599_p7, %p598_p6 }
  0x2e   :  { %p601_p9 = pnand %p600_p8, %p594_p5 }
  0x30   :  { %604 = shalt.err (!%p601_p9)
}
  0x31   :  { %48 = dma.hbm_to_vmem [thread:$0]  %s735_s3, 1024, %s43_s15, [#allocation5], %s611_s27, %s611_s27, %s612_s28  }
  0x32   :  { %605 = dma.done.wait [#allocation3], 1024  }
  0x33   :  { %606 = vsyncadd [#allocation3], 4294966272 }
  0x34   :  { %607 = dma.done.wait [#allocation5], 2048  }
  0x35   :  { %608 = vsyncadd [#allocation5], 4294965248  ;;  %v614_v0 = vmov 0.0   ;;  %vm615_vm0 = vmmov 0   ;;  %v514_v1 = vld [vmem:[#allocation2] sm:$0xff]   ;;  %v516_v3 = vld [vmem:[#allocation2 + $0x8] sm:$0xff]  }
  0x36   :  { %447 = vmatprep.subr.bf16.mxu0 %v614_v0  ;;  %467 = vmatprep.subr.bf16.mxu1 %v614_v0  ;;  %v515_v2 = vld [vmem:[#allocation4] sm:$0xff]   ;;  %v517_v4 = vld [vmem:[#allocation4 + $0x8] sm:$0xff]   ;;  %v518_v5 = vld [vmem:[#allocation2 + $0x10] sm:$0xff]  }
  0x37   :  { %463 = vmatprep.mubr.msk.bf16.mxu0 %vm615_vm0, %v614_v0  ;;  %483 = vmatprep.mubr.msk.bf16.mxu1 %vm615_vm0, %v614_v0  ;;  %v519_v6 = vld [vmem:[#allocation4 + $0x10] sm:$0xff]   ;;  %v520_v7 = vld [vmem:[#allocation2 + $0x18] sm:$0xff]   ;;  %v522_v9 = vld [vmem:[#allocation2 + $0x20] sm:$0xff]  }
  0x38   :  { %448 = vmatpush3.bf16.msra.mxu0 %v514_v1  ;;  %468 = vmatpush3.bf16.msra.mxu1 %v515_v2  ;;  %v521_v8 = vld [vmem:[#allocation4 + $0x18] sm:$0xff]   ;;  %v523_v10 = vld [vmem:[#allocation4 + $0x20] sm:$0xff]   ;;  %v524_v11 = vld [vmem:[#allocation2 + $0x28] sm:$0xff]  }
  0x39   :  { %449 = vmatprep.subr.bf16.mxu0 %v614_v0  ;;  %469 = vmatprep.subr.bf16.mxu1 %v614_v0  ;;  %v525_v12 = vld [vmem:[#allocation4 + $0x28] sm:$0xff]   ;;  %v526_v13 = vld [vmem:[#allocation2 + $0x30] sm:$0xff]   ;;  %v528_v15 = vld [vmem:[#allocation2 + $0x38] sm:$0xff]  }
  0x3a   :  { %v527_v14 = vld [vmem:[#allocation4 + $0x30] sm:$0xff]   ;;  %v529_v16 = vld [vmem:[#allocation4 + $0x38] sm:$0xff]   ;;  %v530_v17 = vld [vmem:[%s732_s0] sm:$0xff]  }
  0x3b   :  { %v531_v18 = vld [vmem:[#allocation6] sm:$0xff]   ;;  %v532_v19 = vld [vmem:[#allocation6 + $0x8] sm:$0xff]   ;;  %v533_v20 = vld [vmem:[#allocation6 + $0x10] sm:$0xff]  }
  0x3c   :  { %450 = vmatpush3.bf16.msra.mxu0 %v516_v3  ;;  %470 = vmatpush3.bf16.msra.mxu1 %v517_v4  ;;  %v534_v21 = vld [vmem:[#allocation6 + $0x18] sm:$0xff]   ;;  %v535_v22 = vld [vmem:[#allocation6 + $0x20] sm:$0xff]   ;;  %v536_v23 = vld [vmem:[#allocation6 + $0x28] sm:$0xff]  }
  0x3d   :  { %451 = vmatprep.subr.bf16.mxu0 %v614_v0  ;;  %471 = vmatprep.subr.bf16.mxu1 %v614_v0  ;;  %v537_v24 = vld [vmem:[#allocation6 + $0x30] sm:$0xff]   ;;  %v538_v25 = vld [vmem:[#allocation6 + $0x38] sm:$0xff]  }
  0x40   :  { %452 = vmatpush3.bf16.msra.mxu0 %v518_v5  ;;  %472 = vmatpush3.bf16.msra.mxu1 %v519_v6 }
  0x41   :  { %453 = vmatprep.subr.bf16.mxu0 %v614_v0  ;;  %473 = vmatprep.subr.bf16.mxu1 %v614_v0 }
  0x44   :  { %454 = vmatpush3.bf16.msra.mxu0 %v520_v7  ;;  %474 = vmatpush3.bf16.msra.mxu1 %v521_v8 }
  0x45   :  { %455 = vmatprep.subr.bf16.mxu0 %v614_v0  ;;  %475 = vmatprep.subr.bf16.mxu1 %v614_v0 }
  0x48   :  { %456 = vmatpush3.bf16.msra.mxu0 %v522_v9  ;;  %476 = vmatpush3.bf16.msra.mxu1 %v523_v10 }
  0x49   :  { %457 = vmatprep.subr.bf16.mxu0 %v614_v0  ;;  %477 = vmatprep.subr.bf16.mxu1 %v614_v0 }
  0x4c   :  { %458 = vmatpush3.bf16.msra.mxu0 %v524_v11  ;;  %478 = vmatpush3.bf16.msra.mxu1 %v525_v12 }
  0x4d   :  { %459 = vmatprep.subr.bf16.mxu0 %v614_v0  ;;  %479 = vmatprep.subr.bf16.mxu1 %v614_v0 }
  0x50   :  { %460 = vmatpush3.bf16.msra.mxu0 %v526_v13  ;;  %480 = vmatpush3.bf16.msra.mxu1 %v527_v14 }
  0x51   :  { %461 = vmatprep.subr.bf16.mxu0 %v614_v0  ;;  %481 = vmatprep.subr.bf16.mxu1 %v614_v0 }
  0x54   :  { %462 = vmatpush3.bf16.msra.mxu0 %v528_v15  ;;  %482 = vmatpush3.bf16.msra.mxu1 %v529_v16 }
  0x55   :  { %487 = vmatprep.subr.bf16.mxu0 %v614_v0 }
  0x57   :  { %464 = vmatmul.mubr.bf16.vlgmr.msra.gmra.mrb[0].mxu0 %v530_v17  ;;  %484 = vmatmul.mubr.bf16.vlgmr.msra.gmra.mrb[0].mxu1 %v530_v17 }
  0x58   :  { %488 = vmatpush3.bf16.msra.mxu0 %v531_v18  ;;  %503 = vmatprep.mubr.msk.bf16.mxu0 %vm615_vm0, %v614_v0 }
  0x59   :  { %489 = vmatprep.subr.bf16.mxu0 %v614_v0 }
  0x5c   :  { %490 = vmatpush3.bf16.msra.mxu0 %v532_v19 }
  0x5d   :  { %491 = vmatprep.subr.bf16.mxu0 %v614_v0 }
  0x60   :  { %492 = vmatpush3.bf16.msra.mxu0 %v533_v20 }
  0x61   :  { %493 = vmatprep.subr.bf16.mxu0 %v614_v0 }
  0x64   :  { %494 = vmatpush3.bf16.msra.mxu0 %v534_v21 }
  0x65   :  { %495 = vmatprep.subr.bf16.mxu0 %v614_v0 }
  0x68   :  { %496 = vmatpush3.bf16.msra.mxu0 %v535_v22 }
  0x69   :  { %497 = vmatprep.subr.bf16.mxu0 %v614_v0 }
  0x6c   :  { %498 = vmatpush3.bf16.msra.mxu0 %v536_v23 }
  0x6d   :  { %499 = vmatprep.subr.bf16.mxu0 %v614_v0 }
  0x70   :  { %500 = vmatpush3.bf16.msra.mxu0 %v537_v24 }
  0x71   :  { %501 = vmatprep.subr.bf16.mxu0 %v614_v0 }
  0x74   :  { %502 = vmatpush3.bf16.msra.mxu0 %v538_v25 }
 0x12a   :  { %v165_v26 = vpop.f32.mrb[0].mxu0  ;;  %v270_v28 = vpop.f32.mrb[0].mxu1 }
 0x12b   :  { %v277_v27 = vmax.f32 %v165_v26, 0.0  ;;  %v465_v29 = vpop.f32.mrb[1].mxu0  ;;  %v485_v30 = vpop.f32.mrb[1].mxu1 }
 0x12c   :  { %v168_v31 = vpop.f32.mrb[2].mxu0  ;;  %v273_v34 = vpop.f32.mrb[2].mxu1 }
 0x12d   :  { %v279_v32 = vmul.f32 %v277_v27, %v270_v28  ;;  %v278_v33 = vmax.f32 %v168_v31, 0.0  ;;  %v466_v35 = vpop.f32.mrb[3].mxu0  ;;  %v486_v36 = vpop.f32.mrb[3].mxu1 }
 0x12f   :  { %v280_v37 = vmul.f32 %v278_v33, %v273_v34 }
 0x131   :  { %v281_v38 = vpack.c.bf16 %v280_v37, %v279_v32 }
 0x133   :  { %504 = vmatmul.mubr.bf16.vlgmr.msra.gmra.mrb[4].mxu0 %v281_v38 }
 0x206   :  { %v380_v39 = vpop.f32.mrb[4].mxu0 }
 0x207   :  { %387 = vst [vmem:[%s736_s4] sm:$0xff] %v380_v39  ;;  %v505_v40 = vpop.f32.mrb[5].mxu0 }
 0x208   :  { %v383_v41 = vpop.f32.mrb[6].mxu0 }
 0x209   :  { %388 = vst [vmem:[%s736_s4 + $0x8] sm:$0xff] %v383_v41  ;;  %v506_v42 = vpop.f32.mrb[7].mxu0 }
 0x20a   :  { %393 = vsyncpa [#allocation3], 1 }
 0x20b   :  { %394 = vsyncpa [#allocation5], 1 }

</bundles_post_ra>
